<compile_context>
chip_gen: v5e
topology: v5e:2x2
jax: 0.10.0
libtpu: 0.0.40
codegen_flags: <defaults>
</compile_context>

<pallas_src>
import functools

import jax
import jax.numpy as jnp
from jax.experimental import pallas as pl
from jax.experimental.pallas import tpu as pltpu


def _pick_hw_tile(hw):
    """Largest lane-dense tile (multiple of 128) that divides HW, else full HW."""
    for t in (2048, 1024, 512, 256, 128):
        if hw % t == 0:
            return t
    return hw  # full-extent block (always legal)


def _pool_gate_cls_kernel(x_ref, w1t_ref, b1_ref, w2t_ref, b2_ref,
                          wfct_ref, bfc_ref, gate_ref, cls_ref, pool_acc,
                          *, inv_hw):
    """Phase 1: per-batch spatial mean of x, then gate + class features.

    x_ref:   (1, C, TILE_HW)   current batch row / spatial tile
    gate_ref:(1, 1, C)         per-batch gate (written at last HW tile)
    cls_ref: (1, 1, classes)   per-batch class features (written at last tile)
    pool_acc:(1, C) f32        spatial-sum accumulator (scratch)
    """
    hw = pl.program_id(1)

    @pl.when(hw == 0)
    def _():
        pool_acc[...] = jnp.zeros_like(pool_acc)

    # Partial spatial sum for this tile (lane reduction).
    pool_acc[...] += jnp.sum(x_ref[...], axis=-1)            # (1, C)

    @pl.when(hw == pl.num_programs(1) - 1)
    def _():
        pool = pool_acc[...] * inv_hw                        # (1, C) = mean_hw(x)

        # attention_conv1 (center-tap linear) + ReLU
        h1 = jnp.dot(pool, w1t_ref[...],
                     preferred_element_type=jnp.float32) + b1_ref[...]
        h1 = jnp.maximum(h1, 0.0)

        # attention_conv2 (center-tap linear) + sigmoid
        gate = jax.nn.sigmoid(
            jnp.dot(h1, w2t_ref[...],
                    preferred_element_type=jnp.float32) + b2_ref[...])
        gate_ref[0] = gate                                   # (1, C)

        # mean_hw(x * gate) == gate * mean_hw(x)  -> no second pass over x.
        cls_ref[0] = jnp.dot(gate * pool, wfct_ref[...],
                             preferred_element_type=jnp.float32) + bfc_ref[...]


def _apply_gate_kernel(x_ref, gate_ref, att_ref):
    """Phase 2: att = x * gate, pure streaming elementwise.

    x_ref:   (1, C, TILE_HW)
    gate_ref:(1, C, 1)        broadcast along lanes
    att_ref: (1, C, TILE_HW)
    """
    att_ref[...] = x_ref[...] * gate_ref[...]


def spectral_attention_forward(x, w1, b1, w2, b2, wfc, bfc):
    """x: (B, C, H, W) f32. Returns (attention (B,C,H,W), class_features (B,classes))."""
    B, C, H, W = x.shape
    HW = H * W
    classes = wfc.shape[0]
    k = w1.shape[-1]
    # PyTorch Conv1d(padding='same') left-pads (k-1)//2, so the effective tap
    # on a length-1 sequence is index (k-1)//2 (== k//2 only for odd k).
    tap = (k - 1) // 2

    w1t = jnp.transpose(w1[:, :, tap]).astype(jnp.float32)   # (C_in, C_out)
    w2t = jnp.transpose(w2[:, :, tap]).astype(jnp.float32)   # (C_in, C_out)
    wfct = jnp.transpose(wfc).astype(jnp.float32)            # (C, classes)

    x_flat = x.reshape(B, C, HW).astype(jnp.float32)
    b1_2d = b1.reshape(1, C).astype(jnp.float32)
    b2_2d = b2.reshape(1, C).astype(jnp.float32)
    bfc_2d = bfc.reshape(1, classes).astype(jnp.float32)

    tile = _pick_hw_tile(HW)
    n_hw = HW // tile

    # ---- Phase 1: stream x once -> pool -> gate, cls ----------------------
    gate_b1c, cls_b1k = pl.pallas_call(
        functools.partial(_pool_gate_cls_kernel, inv_hw=1.0 / float(HW)),
        grid=(B, n_hw),
        in_specs=[
            pl.BlockSpec((1, C, tile), lambda b, h: (b, 0, h)),      # x
            pl.BlockSpec((C, C), lambda b, h: (0, 0)),               # w1t
            pl.BlockSpec((1, C), lambda b, h: (0, 0)),               # b1
            pl.BlockSpec((C, C), lambda b, h: (0, 0)),               # w2t
            pl.BlockSpec((1, C), lambda b, h: (0, 0)),               # b2
            pl.BlockSpec((C, classes), lambda b, h: (0, 0)),         # wfct
            pl.BlockSpec((1, classes), lambda b, h: (0, 0)),         # bfc
        ],
        out_specs=(
            pl.BlockSpec((1, 1, C), lambda b, h: (b, 0, 0)),         # gate
            pl.BlockSpec((1, 1, classes), lambda b, h: (b, 0, 0)),   # cls
        ),
        out_shape=(
            jax.ShapeDtypeStruct((B, 1, C), jnp.float32),
            jax.ShapeDtypeStruct((B, 1, classes), jnp.float32),
        ),
        scratch_shapes=[pltpu.VMEM((1, C), jnp.float32)],
        compiler_params=pltpu.CompilerParams(
            dimension_semantics=("parallel", "arbitrary")),
    )(x_flat, w1t, b1_2d, w2t, b2_2d, wfct, bfc_2d)

    # Tiny (B, C) transpose so the phase-2 broadcast is along lanes.
    gate_bc1 = jnp.transpose(gate_b1c, (0, 2, 1))             # (B, C, 1)

    # ---- Phase 2: att = x * gate (pure streaming, HBM-bound) --------------
    att_flat = pl.pallas_call(
        _apply_gate_kernel,
        grid=(B, n_hw),
        in_specs=[
            pl.BlockSpec((1, C, tile), lambda b, h: (b, 0, h)),      # x
            pl.BlockSpec((1, C, 1), lambda b, h: (b, 0, 0)),         # gate
        ],
        out_specs=pl.BlockSpec((1, C, tile), lambda b, h: (b, 0, h)),
        out_shape=jax.ShapeDtypeStruct((B, C, HW), jnp.float32),
        compiler_params=pltpu.CompilerParams(
            dimension_semantics=("parallel", "parallel")),
    )(x_flat, gate_bc1)

    cls = cls_b1k.reshape(B, classes)
    return att_flat.reshape(B, C, H, W), cls


def _reference_forward(x, w1, b1, w2, b2, wfc, bfc):
    """Pure-JAX reference mirroring the PyTorch module."""
    k = w1.shape[-1]
    tap = (k - 1) // 2
    pool = jnp.mean(x, axis=(2, 3))                            # (B, C)
    h1 = jax.nn.relu(pool @ w1[:, :, tap].T + b1)
    gate = jax.nn.sigmoid(h1 @ w2[:, :, tap].T + b2)
    att = x * gate[:, :, None, None]
    pool_att = jnp.mean(att, axis=(2, 3))
    cls = pool_att @ wfc.T + bfc
    return att, cls


if __name__ == "__main__":
    # filters must be one of {32, 64, 128}; use the smallest -> kernel_size=3.
    B, C, H, W = 2, 32, 16, 16
    classes = 10
    kernel_size = 3

    key = jax.random.PRNGKey(0)
    kx, k1, k2, k3, k4, k5, k6 = jax.random.split(key, 7)

    x = jax.random.normal(kx, (B, C, H, W), dtype=jnp.float32)
    w1 = jax.random.normal(k1, (C, C, kernel_size), dtype=jnp.float32) * 0.1
    b1 = jax.random.normal(k2, (C,), dtype=jnp.float32) * 0.1
    w2 = jax.random.normal(k3, (C, C, kernel_size), dtype=jnp.float32) * 0.1
    b2 = jax.random.normal(k4, (C,), dtype=jnp.float32) * 0.1
    wfc = jax.random.normal(k5, (classes, C), dtype=jnp.float32) * 0.1
    bfc = jax.random.normal(k6, (classes,), dtype=jnp.float32) * 0.1

    att, cls = spectral_attention_forward(x, w1, b1, w2, b2, wfc, bfc)
    jax.block_until_ready((att, cls))

    att_ref, cls_ref = _reference_forward(x, w1, b1, w2, b2, wfc, bfc)
    assert jnp.allclose(att, att_ref, atol=1e-5, rtol=1e-5)
    assert jnp.allclose(cls, cls_ref, atol=1e-4, rtol=1e-4)

    print("KERNEL_OK")
</pallas_src>

<mosaic_0001>
module attributes {stable_mosaic.version = 11 : i64} {
  func.func @_pool_gate_cls_kernel(%arg0: i32, %arg1: i32, %arg2: memref<1x32x256xf32, #tpu.memory_space<vmem>>, %arg3: memref<32x32xf32, #tpu.memory_space<vmem>>, %arg4: memref<1x32xf32, #tpu.memory_space<vmem>>, %arg5: memref<32x32xf32, #tpu.memory_space<vmem>>, %arg6: memref<1x32xf32, #tpu.memory_space<vmem>>, %arg7: memref<32x10xf32, #tpu.memory_space<vmem>>, %arg8: memref<1x10xf32, #tpu.memory_space<vmem>>, %arg9: memref<1x1x32xf32, #tpu.memory_space<vmem>>, %arg10: memref<1x1x10xf32, #tpu.memory_space<vmem>>, %arg11: memref<1x32xf32, #tpu.memory_space<vmem>>) attributes {dimension_semantics = [#tpu.dimension_semantics<parallel>, #tpu.dimension_semantics<arbitrary>], iteration_bounds = array<i64: 2, 1>, scalar_prefetch = 0 : i64, scratch_operands = 1 : i64, tpu.core_type = #tpu.core_type<tc>, window_params = [{transform_indices = @transform_0, window_bounds = array<i64: 1, 32, 256>}, {pipeline_mode = #tpu.pipeline_mode<synchronous>, transform_indices = @transform_1, window_bounds = array<i64: 32, 32>}, {pipeline_mode = #tpu.pipeline_mode<synchronous>, transform_indices = @transform_2, window_bounds = array<i64: 1, 32>}, {pipeline_mode = #tpu.pipeline_mode<synchronous>, transform_indices = @transform_3, window_bounds = array<i64: 32, 32>}, {pipeline_mode = #tpu.pipeline_mode<synchronous>, transform_indices = @transform_4, window_bounds = array<i64: 1, 32>}, {pipeline_mode = #tpu.pipeline_mode<synchronous>, transform_indices = @transform_5, window_bounds = array<i64: 32, 10>}, {pipeline_mode = #tpu.pipeline_mode<synchronous>, transform_indices = @transform_6, window_bounds = array<i64: 1, 10>}, {transform_indices = @transform_7, window_bounds = array<i64: 1, 1, 32>}, {transform_indices = @transform_8, window_bounds = array<i64: 1, 1, 10>}]} {
    %c0_i32 = arith.constant 0 : i32
    %0 = arith.cmpi eq, %arg1, %c0_i32 : i32
    %1 = arith.extui %0 : i1 to i32
    %c0_i32_0 = arith.constant 0 : i32
    %2 = arith.cmpi ne, %1, %c0_i32_0 : i32
    scf.if %2 {
      %cst_9 = arith.constant 0.000000e+00 : f32
      %11 = vector.broadcast %cst_9 : f32 to vector<1x32xf32>
      %c0_10 = arith.constant 0 : index
      %c0_11 = arith.constant 0 : index
      %12 = vector.load %arg11[%c0_10, %c0_11] : memref<1x32xf32, #tpu.memory_space<vmem>>, vector<1x32xf32>
      tpu.vector_store %arg11[%c0_10, %c0_11], %11 {strides = array<i32>} : memref<1x32xf32, #tpu.memory_space<vmem>>, vector<1x32xf32>,
    } else {
    }
    %c0 = arith.constant 0 : index
    %c0_1 = arith.constant 0 : index
    %3 = vector.load %arg11[%c0, %c0_1] : memref<1x32xf32, #tpu.memory_space<vmem>>, vector<1x32xf32>
    %c0_2 = arith.constant 0 : index
    %c0_3 = arith.constant 0 : index
    %c0_4 = arith.constant 0 : index
    %4 = vector.load %arg2[%c0_2, %c0_3, %c0_4] : memref<1x32x256xf32, #tpu.memory_space<vmem>>, vector<1x32x256xf32>
    %cst = arith.constant dense<0.000000e+00> : vector<1x32xf32>
    %5 = vector.multi_reduction <add>, %4, %cst [2] : vector<1x32x256xf32> to vector<1x32xf32>
    %6 = arith.addf %3, %5 : vector<1x32xf32>
    %c0_5 = arith.constant 0 : index
    %c0_6 = arith.constant 0 : index
    %7 = vector.load %arg11[%c0_5, %c0_6] : memref<1x32xf32, #tpu.memory_space<vmem>>, vector<1x32xf32>
    tpu.vector_store %arg11[%c0_5, %c0_6], %6 {strides = array<i32>} : memref<1x32xf32, #tpu.memory_space<vmem>>, vector<1x32xf32>,
    %c0_i32_7 = arith.constant 0 : i32
    %8 = arith.cmpi eq, %arg1, %c0_i32_7 : i32
    %9 = arith.extui %8 : i1 to i32
    %c0_i32_8 = arith.constant 0 : i32
    %10 = arith.cmpi ne, %9, %c0_i32_8 : i32
    scf.if %10 {
      %c0_9 = arith.constant 0 : index
      %c0_10 = arith.constant 0 : index
      %11 = vector.load %arg11[%c0_9, %c0_10] : memref<1x32xf32, #tpu.memory_space<vmem>>, vector<1x32xf32>
      %cst_11 = arith.constant 3.906250e-03 : f32
      %12 = vector.broadcast %cst_11 : f32 to vector<1x32xf32>
      %13 = arith.mulf %11, %12 : vector<1x32xf32>
      %c0_12 = arith.constant 0 : index
      %c0_13 = arith.constant 0 : index
      %14 = vector.load %arg3[%c0_12, %c0_13] : memref<32x32xf32, #tpu.memory_space<vmem>>, vector<32x32xf32>
      %cst_14 = arith.constant dense<0.000000e+00> : vector<1x32xf32>
      %15 = tpu.matmul %13, %14, %cst_14 {dimension_numbers = #tpu.dot_dimension_numbers<[1], [0], [0], [1], [0, 0, 1, 1], [], []>} : vector<1x32xf32>, vector<32x32xf32>, vector<1x32xf32> -> vector<1x32xf32>
      %c0_15 = arith.constant 0 : index
      %c0_16 = arith.constant 0 : index
      %16 = vector.load %arg4[%c0_15, %c0_16] : memref<1x32xf32, #tpu.memory_space<vmem>>, vector<1x32xf32>
      %17 = arith.addf %15, %16 : vector<1x32xf32>
      %cst_17 = arith.constant 0.000000e+00 : f32
      %18 = vector.broadcast %cst_17 : f32 to vector<1x32xf32>
      %19 = arith.maximumf %17, %18 : vector<1x32xf32>
      %c0_18 = arith.constant 0 : index
      %c0_19 = arith.constant 0 : index
      %20 = vector.load %arg5[%c0_18, %c0_19] : memref<32x32xf32, #tpu.memory_space<vmem>>, vector<32x32xf32>
      %cst_20 = arith.constant dense<0.000000e+00> : vector<1x32xf32>
      %21 = tpu.matmul %19, %20, %cst_20 {dimension_numbers = #tpu.dot_dimension_numbers<[1], [0], [0], [1], [0, 0, 1, 1], [], []>} : vector<1x32xf32>, vector<32x32xf32>, vector<1x32xf32> -> vector<1x32xf32>
      %c0_21 = arith.constant 0 : index
      %c0_22 = arith.constant 0 : index
      %22 = vector.load %arg6[%c0_21, %c0_22] : memref<1x32xf32, #tpu.memory_space<vmem>>, vector<1x32xf32>
      %23 = arith.addf %21, %22 : vector<1x32xf32>
      %24 = arith.negf %23 : vector<1x32xf32>
      %25 = math.exp %24 : vector<1x32xf32>
      %cst_23 = arith.constant 1.000000e+00 : f32
      %26 = vector.broadcast %cst_23 : f32 to vector<1x32xf32>
      %27 = arith.addf %26, %25 : vector<1x32xf32>
      %28 = arith.divf %26, %27 : vector<1x32xf32>
      %c0_24 = arith.constant 0 : index
      %c0_25 = arith.constant 0 : index
      %c0_26 = arith.constant 0 : index
      %29 = vector.load %arg9[%c0_24, %c0_25, %c0_26] : memref<1x1x32xf32, #tpu.memory_space<vmem>>, vector<1x1x32xf32>
      %30 = vector.shape_cast %29 : vector<1x1x32xf32> to vector<1x32xf32>
      %31 = vector.shape_cast %28 : vector<1x32xf32> to vector<1x1x32xf32>
      tpu.vector_store %arg9[%c0_24, %c0_25, %c0_26], %31 {strides = array<i32>} : memref<1x1x32xf32, #tpu.memory_space<vmem>>, vector<1x1x32xf32>,
      %32 = arith.mulf %28, %13 : vector<1x32xf32>
      %c0_27 = arith.constant 0 : index
      %c0_28 = arith.constant 0 : index
      %33 = vector.load %arg7[%c0_27, %c0_28] : memref<32x10xf32, #tpu.memory_space<vmem>>, vector<32x10xf32>
      %cst_29 = arith.constant dense<0.000000e+00> : vector<1x10xf32>
      %34 = tpu.matmul %32, %33, %cst_29 {dimension_numbers = #tpu.dot_dimension_numbers<[1], [0], [0], [1], [0, 0, 1, 1], [], []>} : vector<1x32xf32>, vector<32x10xf32>, vector<1x10xf32> -> vector<1x10xf32>
      %c0_30 = arith.constant 0 : index
      %c0_31 = arith.constant 0 : index
      %35 = vector.load %arg8[%c0_30, %c0_31] : memref<1x10xf32, #tpu.memory_space<vmem>>, vector<1x10xf32>
      %36 = arith.addf %34, %35 : vector<1x10xf32>
      %c0_32 = arith.constant 0 : index
      %c0_33 = arith.constant 0 : index
      %c0_34 = arith.constant 0 : index
      %37 = vector.load %arg10[%c0_32, %c0_33, %c0_34] : memref<1x1x10xf32, #tpu.memory_space<vmem>>, vector<1x1x10xf32>
      %38 = vector.shape_cast %37 : vector<1x1x10xf32> to vector<1x10xf32>
      %39 = vector.shape_cast %36 : vector<1x10xf32> to vector<1x1x10xf32>
      tpu.vector_store %arg10[%c0_32, %c0_33, %c0_34], %39 {strides = array<i32>} : memref<1x1x10xf32, #tpu.memory_space<vmem>>, vector<1x1x10xf32>,
    } else {
    }
    return
  }
  func.func @transform_0(%arg0: i32, %arg1: i32) -> (i32, i32, i32) {
    %c0_i32 = arith.constant 0 : i32
    %c0_i32_0 = arith.constant 0 : i32
    return %arg0, %c0_i32, %arg1 : i32, i32, i32
  }
  func.func @transform_1(%arg0: i32, %arg1: i32) -> (i32, i32) {
    %c0_i32 = arith.constant 0 : i32
    %c0_i32_0 = arith.constant 0 : i32
    %c0_i32_1 = arith.constant 0 : i32
    return %c0_i32, %c0_i32_0 : i32, i32
  }
  func.func @transform_2(%arg0: i32, %arg1: i32) -> (i32, i32) {
    %c0_i32 = arith.constant 0 : i32
    %c0_i32_0 = arith.constant 0 : i32
    %c0_i32_1 = arith.constant 0 : i32
    return %c0_i32, %c0_i32_0 : i32, i32
  }
  func.func @transform_3(%arg0: i32, %arg1: i32) -> (i32, i32) {
    %c0_i32 = arith.constant 0 : i32
    %c0_i32_0 = arith.constant 0 : i32
    %c0_i32_1 = arith.constant 0 : i32
    return %c0_i32, %c0_i32_0 : i32, i32
  }
  func.func @transform_4(%arg0: i32, %arg1: i32) -> (i32, i32) {
    %c0_i32 = arith.constant 0 : i32
    %c0_i32_0 = arith.constant 0 : i32
    %c0_i32_1 = arith.constant 0 : i32
    return %c0_i32, %c0_i32_0 : i32, i32
  }
  func.func @transform_5(%arg0: i32, %arg1: i32) -> (i32, i32) {
    %c0_i32 = arith.constant 0 : i32
    %c0_i32_0 = arith.constant 0 : i32
    %c0_i32_1 = arith.constant 0 : i32
    return %c0_i32, %c0_i32_0 : i32, i32
  }
  func.func @transform_6(%arg0: i32, %arg1: i32) -> (i32, i32) {
    %c0_i32 = arith.constant 0 : i32
    %c0_i32_0 = arith.constant 0 : i32
    %c0_i32_1 = arith.constant 0 : i32
    return %c0_i32, %c0_i32_0 : i32, i32
  }
  func.func @transform_7(%arg0: i32, %arg1: i32) -> (i32, i32, i32) {
    %c0_i32 = arith.constant 0 : i32
    %c0_i32_0 = arith.constant 0 : i32
    %c0_i32_1 = arith.constant 0 : i32
    return %arg0, %c0_i32, %c0_i32_0 : i32, i32, i32
  }
  func.func @transform_8(%arg0: i32, %arg1: i32) -> (i32, i32, i32) {
    %c0_i32 = arith.constant 0 : i32
    %c0_i32_0 = arith.constant 0 : i32
    %c0_i32_1 = arith.constant 0 : i32
    return %arg0, %c0_i32, %c0_i32_0 : i32, i32, i32
  }
}

</mosaic_0001>

<bundles_post_ra>
// kernel: tpu_custom_call.1
= control target key start
LH: loop header
LB: loop body
LE: loop exit
PB: predicated region body
PF: predicated region fallthrough
CT: control target
= control target key end

     0   :  { %s1311_s0 = inlined_call_operand.hbm [shape: f32[2,32,256], index: 0, kind: input, shape index: {}]   ;;  %s1312_s1 = inlined_call_operand.vmem [shape: f32[32,32], index: 1, kind: input, shape index: {}]   ;;  %s1313_s2 = inlined_call_operand.vmem [shape: f32[1,32], index: 2, kind: input, shape index: {}]   ;;  %s1314_s3 = inlined_call_operand.hbm [shape: f32[32,32], index: 3, kind: input, shape index: {}]   ;;  %s1315_s4 = inlined_call_operand.vmem [shape: f32[1,32], index: 4, kind: input, shape index: {}]   ;;  %s1316_s5 = inlined_call_operand.vmem [shape: f32[32,10], index: 5, kind: input, shape index: {}]   ;;  %s1317_s6 = inlined_call_operand.vmem [shape: f32[1,10], index: 6, kind: input, shape index: {}]   ;;  %s1318_s7 = inlined_call_operand.hbm [shape: f32[2,1,32], index: 7, kind: output, shape index: {0}]   ;;  %s1319_s8 = inlined_call_operand.hbm [shape: f32[2,1,10], index: 8, kind: output, shape index: {1}]  }
   0x1   :  { %1325 = sst [smem:[#allocation19_spill]] %s1314_s3 }
   0x2   :  { %1326 = sst [smem:[#allocation20_spill]] %s1317_s6 }
   0x3   :  { %14 = vsyncpa [#allocation4], 0 }
   0x4   :  { %16 = vsyncpa [#allocation4 + $0x1], 0 }
   0x5   :  { %17 = vsyncpa [#allocation7], 0 }
   0x6   :  { %18 = vsyncpa [#allocation5], 0 }
   0x7   :  { %20 = vsyncpa [#allocation5 + $0x1], 0 }
   0x8   :  { %21 = vsyncpa [#allocation10], 0 }
   0x9   :  { %23 = vsyncpa [#allocation10 + $0x1], 0  ;;  %s1106_s27 = smov 0   ;;  %s1108_s28 = smov 0  }
   0xa   :  { %s1110_s29 = smov 0   ;;  %s1112_s30 = smov 0  }
   0xb   :  { %s1114_s9 = smov 0   ;;  %s1116_s10 = smov 0  }
   0xc LB: > { %1327 = sst [smem:[#allocation15_spill]] %s1032_s27  ;;  %s765_s11 = sadd.s32 4294967295, %s1052_s10   ;;  %s1052_s10 = sphi %s1116_s10, %s29_s10   ;;  %s1048_s9 = sphi %s1114_s9, %s1348_s9   ;;  %s1044_s30 = sphi %s1112_s30, %s1347_s30   ;;  %s1040_s29 = sphi %s1110_s29, %s1346_s29   ;;  %s1036_s28 = sphi %s1108_s28, %s1345_s28   ;;  %s1032_s27 = sphi %s1106_s27, %s1344_s27  }
   0xd   : > { %1328 = sst [smem:[#allocation16_spill]] %s1052_s10  ;;  %s766_s12 = sadd.s32 4294967294, %s1052_s10  }
   0xe   : > { %p63_p0 = scmp.ne.s32.totalorder %s1036_s28, %s1032_s27  ;;  %p1140_p1 = scmp.eq.s32.totalorder %s765_s11, 0 }
   0xf   : > { %p1144_p2 = scmp.eq.s32.totalorder %s765_s11, 1  ;;  %p219_p3 = scmp.eq.s32.totalorder %s766_s12, 1 }
  0x10   : > { %p1150_p4 = por %p1140_p1, %p63_p0  ;;  %p767_p5 = scmp.ge.s32.totalorder %s1052_s10, 1 }
  0x11   : > { %p1155_p6 = por %p219_p3, %p63_p0  ;;  %p252_p7 = scmp.lt.s32.totalorder %s1052_s10, 3 }
  0x12   : > { %s1334_s3 = sld [smem:[#allocation19_spill]]  ;;  %s1054_s21 = smov [#allocation6]  }
  0x13   : > { %s1332_s16 = scalar_select %p1155_p6, 1, 0 }
  0x14   : > { %p1163_p8 = pnand %p767_p5, %p252_p7  ;;  %s271_s22 = sshll.u32 %s1054_s21, 4  ;;  %s272_s22 = int_to_ptr.vmem [resolvable:$true] %s271_s22 }
  0x15   : > { %1333 = sst [smem:[#allocation17_spill]] %s1332_s16  ;;  %p769_p11 = scmp.ge.s32.totalorder %s1052_s10, 2 }
  0x16   : > { %p793_p9 = pneg %p1163_p8  ;;  %s1055_s23 = smov 128  }
  0x17   : > { %s1056_s24 = smov 8   ;;  %s41_s25 = sadd.s32 1, %s1048_s9 }
  0x18   : > { %s269_s19 = sshll.u32 %s1334_s3, 4  ;;  %p794_p10 = pnand %p793_p9, %p1140_p1  ;;  %s270_s19 = int_to_ptr.hbm [resolvable:$true] %s269_s19 }
  0x19   : > { %p43_p12 = scmp.ge.s32.totalorder %s41_s25, 2  ;;  %s50_s26 = sadd.s32 1, %s1040_s29 }
  0x1a   : > { %796 = dma.hbm_to_vmem [thread:$0]  (!%p794_p10), %s270_s19, 512, %s272_s22, [#allocation7], %s1055_s23, %s1055_s23, %s1056_s24  }
  0x1b   : > { %p57_p13 = scmp.ne.s32.totalorder %s1040_s29, %s1036_s28  ;;  %p58_p0 = scmp.eq.s32.totalorder %s1052_s10, 0 }
  0x1c   : > { %s1350_s25 = smov (%p43_p12, %s41_s25), 0  ;;  %p809_p7 = scmp.lt.s32.totalorder %s1052_s10, 2 }
  0x1d   : > { %1336 = sst [smem:[#allocation18_spill]] %s1350_s25  ;;  %p1179_p3 = por %p58_p0, %p57_p13 }
  0x1e   : > { %p1185_p5 = por %p1144_p2, %p57_p13  ;;  %s45_s17 = ssub.s32 %s1048_s9, %s1350_s25 }
  0x1f   : > { %p48_p9 = scmp.eq.s32.totalorder %s45_s17, 0  ;;  %s294_s18 = sand.u32 1, %s1040_s29  }
  0x20   : > { %s770_s19 = sshll.u32 %s294_s18, 6  ;;  %s782_s22 = sshll.u32 %s1048_s9, 6 }
  0x21   : > { %s1194_s21 = scalar_select %p48_p9, %s1040_s29, %s50_s26  }
  0x22   : > { %s305_s3 = scalar_lea.hbm %s1311_s0, %s782_s22  ;;  %s298_s16 = scalar_lea.vmem [#allocation3], %s770_s19 }
  0x23   : > { %s308_s27 = sshll.u32 %s298_s16, 4  ;;  %s306_s14 = sshll.u32 %s305_s3, 4  ;;  %s309_s27 = int_to_ptr.vmem [resolvable:$true] %s308_s27  ;;  %s307_s14 = int_to_ptr.hbm [resolvable:$true] %s306_s14 }
  0x24   : > { %p798_p2 = pnand %p809_p7, %p1179_p3  ;;  %s295_s6 = scalar_lea.sflag [#allocation4], %s294_s18 }
  0x25   : > { %s1057_s25 = smov 256   ;;  %s1058_s10 = smov 16  }
  0x26   : > { %800 = dma.hbm_to_vmem [thread:$0]  (!%p798_p2), %s307_s14, 1024, %s309_s27, %s295_s6, %s1057_s25, %s1057_s25, %s1058_s10  }
  0x27   : > { %320 = sbr.rel (%p1163_p8) target bundleno = 783 (0x30f), region = 48  ;;  %s1205_s26 = sand.u32 (!%p1163_p8), 1, %s1036_s28  }
  0x28   : > { %s774_s17 = sshll.u32 (!%p1163_p8), %s1205_s26, 6  ;;  %s323_s16 = scalar_lea.sflag (!%p1163_p8), [#allocation4], %s1205_s26 }
  0x29   : > { %s326_s3 = scalar_lea.vmem (!%p1163_p8), [#allocation3], %s774_s17 }
  0x2c   : > { %1015 = dma.done.wait (%p1150_p4), %s323_s16, 1024  }
  0x2d   : > { %1017 = vsyncadd (%p1150_p4), %s323_s16, 4294966272 }
  0x2e   : > { %1019 = dma.done.wait (%p1140_p1), [#allocation7], 512  }
  0x2f   : > { %1021 = vsyncadd (%p1140_p1), [#allocation7], 4294966784  ;;  %v376_v0 = vld [vmem:[%s326_s3] sm:$0xff]  ;;  %v377_v1 = vld [vmem:[%s326_s3 + $0x8] sm:$0xff]  ;;  %v1059_v12 = vmov 0   ;;  %vm373_vm0 = vcmask 253952   ;;  %v487_v60 = vlaneseq  ;;  %s633_s25 = scalar_lea.hbm %s1318_s7, %s1044_s30 }
  0x30   : > { %v384_v2 = vadd.f32 %v377_v1, %v376_v0  ;;  %v380_v3 = vld [vmem:[%s326_s3 + $0x20] sm:$0xff]  ;;  %v381_v4 = vld [vmem:[%s326_s3 + $0x28] sm:$0xff]  ;;  %v378_v6 = vld [vmem:[%s326_s3 + $0x10] sm:$0xff]  ;;  %867 = vset.pattern.permute.xlu2 %v1059_v12  ;;  %868 = vset.pattern.permute.xlu0 %v1059_v12  ;;  %v1060_v53 = vmov 0.0   ;;  %vm492_vm1 = vcmask 130112   ;;  %vm496_vm2 = vcmask 195712  }
  0x31   : > { %v390_v5 = vadd.f32 %v381_v4, %v380_v3  ;;  %v379_v7 = vld [vmem:[%s326_s3 + $0x18] sm:$0xff]  ;;  %v382_v8 = vld [vmem:[%s326_s3 + $0x30] sm:$0xff]  ;;  %869 = vset.pattern.permute.xlu1 %v1059_v12  ;;  %374 = vst.msk [vmem:[#allocation2] sm:$0x1] %vm373_vm0, %v1060_v53  ;;  %v513_v55 = vld [vmem:[%s1312_s1 + $0x10] sm:$0xff]  ;;  %v488_v61 = vand.u32 127, %v487_v60 }
  0x32   : > { %385 = vadd.xlane.f32.xlu0 %v384_v2  ;;  %v383_v9 = vld [vmem:[%s326_s3 + $0x38] sm:$0xff]  ;;  %v387_v10 = vadd.f32 %v379_v7, %v378_v6  ;;  %v514_v54 = vld [vmem:[%s1312_s1 + $0x18] sm:$0xff]  ;;  %vm500_vm3 = vcmask 261312   ;;  %vm516_vm4 = vcmask 261120   ;;  %s361_s13 = scalar_lea.vmem [#allocation8], %s1205_s26  ;;  %s637_s18 = sshll.u32 %s633_s25, 4  ;;  %s638_s18 = int_to_ptr.hbm [resolvable:$true] %s637_s18 }
  0x33   : > { %391 = vadd.xlane.f32.xlu1 %v390_v5  ;;  %v393_v11 = vadd.f32 %v383_v9, %v382_v8  ;;  %532 = vmatpush.msra.mxu0 %v514_v54  ;;  %v512_v56 = vld [vmem:[%s1312_s1 + $0x8] sm:$0xff]  ;;  %v511_v57 = vld [vmem:[%s1312_s1] sm:$0xff]  ;;  %v490_v62 = vadd.s32 4294967288, %v488_v61  ;;  %v494_v0 = vadd.s32 4294967280, %v488_v61  ;;  %v498_v3 = vadd.s32 4294967272, %v488_v61  ;;  %s635_s11 = sshll.u32 %s361_s13, 4  ;;  %s636_s11 = int_to_ptr.vmem [resolvable:$true] %s635_s11 }
  0x34   : > { %v544_v59 = vld [vmem:[#allocation6 + $0x18] sm:$0xff]  ;;  %s621_s19 = scalar_lea.sflag [#allocation5], %s1205_s26  ;;  %s948_s22 = sshra.s32 %s638_s18, 4  ;;  %s949_s22 = int_to_ptr.hbm [resolvable:$true] %s948_s22 }
  0x35   : > { %533 = vmatpush.msra.mxu0 %v513_v55  ;;  %561 = vmatpush.msra.mxu1 %v544_v59  ;;  %s950_s23 = scalar_lea.hbm %s949_s22, 1  ;;  %s954_s17 = scalar_lea.hbm %s1318_s7, 2 }
  0x36   : > { %p951_p1 = scmp.ne.s32.totalorder %s949_s22, %s950_s23  ;;  %p955_p10 = scmp.lt.s32.totalorder %s949_s22, %s1318_s7 }
  0x37   : > { %534 = vmatpush.msra.mxu0 %v512_v56  ;;  %p956_p12 = scmp.lt.s32.totalorder %s954_s17, %s950_s23 }
  0x38   : > { %v375_v8 = vld [vmem:[#allocation2] sm:$0x1]  ;;  %p952_p4 = pnand %p951_p1, %p1185_p5 }
  0x39   : > { %535 = vmatpush.msra.mxu0 %v511_v57  ;;  %p957_p13 = por %p956_p12, %p955_p10 }
  0x3a   : > { %388 = vadd.xlane.f32.xlu0 %v387_v10  ;;  %p953_p8 = pneg %p952_p4 }
  0x3b   : > { %394 = vadd.xlane.f32.xlu1 %v393_v11 }
  0x3c   : > { %p958_p0 = pnand %p957_p13, %p953_p8 }
  0xa5   : > { %v386_v13 = vpop.xlane.xlu0 %385 }
  0xa6   : > { %v400_v14 = vperm.slane %v386_v13, 0  ;;  %v401_v15 = vperm.slane %v386_v13, 1  ;;  %v402_v16 = vperm.slane %v386_v13, 2  ;;  %v403_v17 = vperm.slane %v386_v13, 3  ;;  %v392_v32 = vpop.xlane.xlu1 %391 }
  0xa7   : > { %v404_v18 = vperm.slane %v386_v13, 4  ;;  %v405_v19 = vperm.slane %v386_v13, 5  ;;  %v406_v20 = vperm.slane %v386_v13, 6  ;;  %v407_v21 = vperm.slane %v386_v13, 7 }
  0xa8   : > { %432 = vst [vmem:[#allocation1] ss:$9 sm:$0xff] %v400_v14  ;;  %v416_v33 = vperm.slane %v392_v32, 0  ;;  %v417_v34 = vperm.slane %v392_v32, 1  ;;  %v418_v35 = vperm.slane %v392_v32, 2  ;;  %v419_v37 = vperm.slane %v392_v32, 3 }
  0xa9   : > { %434 = vst [vmem:[#allocation1 + $0x1] ss:$9 sm:$0xff] %v401_v15  ;;  %v420_v38 = vperm.slane %v392_v32, 4  ;;  %v421_v39 = vperm.slane %v392_v32, 5  ;;  %v422_v40 = vperm.slane %v392_v32, 6  ;;  %v423_v41 = vperm.slane %v392_v32, 7 }
  0xaa   : > { %436 = vst [vmem:[#allocation1 + $0x2] ss:$9 sm:$0xff] %v402_v16  ;;  %v543_v15 = vld [vmem:[#allocation6 + $0x10] sm:$0xff]  ;;  %v542_v16 = vld [vmem:[#allocation6 + $0x8] sm:$0xff] }
  0xab   : > { %438 = vst [vmem:[#allocation1 + $0x3] ss:$9 sm:$0xff] %v403_v17  ;;  %562 = vmatpush.msra.mxu1 %v543_v15  ;;  %v541_v17 = vld [vmem:[#allocation6] sm:$0xff] }
  0xac   : > { %440 = vst [vmem:[#allocation1 + $0x4] ss:$9 sm:$0xff] %v404_v18  ;;  %v515_v18 = vld [vmem:[%s1313_s2] sm:$0x1] }
  0xad   : > { %442 = vst [vmem:[#allocation1 + $0x5] ss:$9 sm:$0xff] %v405_v19  ;;  %v389_v22 = vpop.xlane.xlu0 %388  ;;  %563 = vmatpush.msra.mxu1 %v542_v16 }
  0xae   : > { %444 = vst [vmem:[#allocation1 + $0x6] ss:$9 sm:$0xff] %v406_v20  ;;  %v408_v23 = vperm.slane %v389_v22, 0  ;;  %v409_v24 = vperm.slane %v389_v22, 1  ;;  %v410_v25 = vperm.slane %v389_v22, 2  ;;  %v411_v27 = vperm.slane %v389_v22, 3  ;;  %v395_v42 = vpop.xlane.xlu1 %394 }
  0xaf   : > { %446 = vst [vmem:[#allocation1 + $0x7] ss:$9 sm:$0xff] %v407_v21  ;;  %v412_v28 = vperm.slane %v389_v22, 4  ;;  %v413_v29 = vperm.slane %v389_v22, 5  ;;  %v414_v30 = vperm.slane %v389_v22, 6  ;;  %v415_v31 = vperm.slane %v389_v22, 7  ;;  %564 = vmatpush.msra.mxu1 %v541_v17 }
  0xb0   : > { %v424_v43 = vperm.slane %v395_v42, 0  ;;  %v425_v44 = vperm.slane %v395_v42, 1  ;;  %v426_v45 = vperm.slane %v395_v42, 2  ;;  %v427_v46 = vperm.slane %v395_v42, 3  ;;  %v593_v22 = vld [vmem:[%s1316_s5 + $0x18] sm:$0xff] }
  0xb1   : > { %v428_v48 = vperm.slane %v395_v42, 4  ;;  %v429_v49 = vperm.slane %v395_v42, 5  ;;  %v430_v50 = vperm.slane %v395_v42, 6  ;;  %v431_v51 = vperm.slane %v395_v42, 7  ;;  %610 = vmatpush.msra.mxu2 %v593_v22 }
  0xb6   : > { %v447_v26 = vld [vmem:[#allocation1] sm:$0xff] }
  0xb7   : > { %448 = vst [vmem:[#allocation1] ss:$9 sm:$0xff] %v408_v23  ;;  %476 = vperm.xlu2 %867, %v447_v26   ;;  %v592_v23 = vld [vmem:[%s1316_s5 + $0x10] sm:$0xff]  ;;  %v545_v26 = vld [vmem:[%s1315_s4] sm:$0x1] }
  0xb8   : > { %449 = vst [vmem:[#allocation1 + $0x1] ss:$9 sm:$0xff] %v409_v24  ;;  %v591_v24 = vld [vmem:[%s1316_s5 + $0x8] sm:$0xff]  ;;  %611 = vmatpush.msra.mxu2 %v592_v23 }
  0xb9   : > { %450 = vst [vmem:[#allocation1 + $0x2] ss:$9 sm:$0xff] %v410_v25  ;;  %v590_v25 = vld [vmem:[%s1316_s5] sm:$0xff] }
  0xba   : > { %451 = vst [vmem:[#allocation1 + $0x3] ss:$9 sm:$0xff] %v411_v27  ;;  %612 = vmatpush.msra.mxu2 %v591_v24 }
  0xbb   : > { %452 = vst [vmem:[#allocation1 + $0x4] ss:$9 sm:$0xff] %v412_v28 }
  0xbc   : > { %453 = vst [vmem:[#allocation1 + $0x5] ss:$9 sm:$0xff] %v413_v29  ;;  %613 = vmatpush.msra.mxu2 %v590_v25 }
  0xbd   : > { %454 = vst [vmem:[#allocation1 + $0x6] ss:$9 sm:$0xff] %v414_v30 }
  0xbe   : > { %455 = vst [vmem:[#allocation1 + $0x7] ss:$9 sm:$0xff] %v415_v31 }
  0xc5   : > { %v456_v36 = vld [vmem:[#allocation1] sm:$0xff] }
  0xc6   : > { %457 = vst [vmem:[#allocation1] ss:$9 sm:$0xff] %v416_v33  ;;  %479 = vperm.xlu2 %867, %v456_v36  }
  0xc7   : > { %458 = vst [vmem:[#allocation1 + $0x1] ss:$9 sm:$0xff] %v417_v34 }
  0xc8   : > { %459 = vst [vmem:[#allocation1 + $0x2] ss:$9 sm:$0xff] %v418_v35 }
  0xc9   : > { %460 = vst [vmem:[#allocation1 + $0x3] ss:$9 sm:$0xff] %v419_v37 }
  0xca   : > { %461 = vst [vmem:[#allocation1 + $0x4] ss:$9 sm:$0xff] %v420_v38 }
  0xcb   : > { %462 = vst [vmem:[#allocation1 + $0x5] ss:$9 sm:$0xff] %v421_v39 }
  0xcc   : > { %463 = vst [vmem:[#allocation1 + $0x6] ss:$9 sm:$0xff] %v422_v40 }
  0xcd   : > { %464 = vst [vmem:[#allocation1 + $0x7] ss:$9 sm:$0xff] %v423_v41 }
  0xd4   : > { %v465_v47 = vld [vmem:[#allocation1] sm:$0xff] }
  0xd5   : > { %482 = vperm.xlu0 %868, %v465_v47   ;;  %466 = vst [vmem:[#allocation1] ss:$9 sm:$0xff] %v424_v43 }
  0xd6   : > { %467 = vst [vmem:[#allocation1 + $0x1] ss:$9 sm:$0xff] %v425_v44 }
  0xd7   : > { %468 = vst [vmem:[#allocation1 + $0x2] ss:$9 sm:$0xff] %v426_v45 }
  0xd8   : > { %469 = vst [vmem:[#allocation1 + $0x3] ss:$9 sm:$0xff] %v427_v46 }
  0xd9   : > { %470 = vst [vmem:[#allocation1 + $0x4] ss:$9 sm:$0xff] %v428_v48 }
  0xda   : > { %471 = vst [vmem:[#allocation1 + $0x5] ss:$9 sm:$0xff] %v429_v49 }
  0xdb   : > { %472 = vst [vmem:[#allocation1 + $0x6] ss:$9 sm:$0xff] %v430_v50 }
  0xdc   : > { %473 = vst [vmem:[#allocation1 + $0x7] ss:$9 sm:$0xff] %v431_v51 }
  0xe3   : > { %v474_v52 = vld [vmem:[#allocation1] sm:$0xff] }
  0xe4   : > { %485 = vperm.xlu1 %869, %v474_v52  }
 0x111   : > { %v477_v58 = vpop.permute.xlu2 %476 }
 0x112   : > { %v489_v5 = vperm.slane %v477_v58, %v488_v61 }
 0x120   : > { %v480_v63 = vpop.permute.xlu2 %479 }
 0x121   : > { %v491_v2 = vperm.slane %v480_v63, %v490_v62 }
 0x123   : > { %v493_v7 = vsel %vm492_vm1, %v491_v2, %v489_v5 }
 0x147   : > { %v483_v1 = vpop.permute.xlu0 %482 }
 0x148   : > { %v495_v4 = vperm.slane %v483_v1, %v494_v0 }
 0x14a   : > { %v497_v10 = vsel %vm496_vm2, %v495_v4, %v493_v7 }
 0x156   : > { %v486_v6 = vpop.permute.xlu1 %485 }
 0x157   : > { %v499_v9 = vperm.slane %v486_v6, %v498_v3 }
 0x159   : > { %v501_v11 = vsel %vm500_vm3, %v499_v9, %v497_v10 }
 0x15a   : > { %v503_v12 = vadd.f32 %v501_v11, %v375_v8 }
 0x15c   : > { %505 = vst.msk [vmem:[#allocation2] sm:$0x1] %vm373_vm0, %v503_v12 }
 0x163   : > { %v509_v13 = vld [vmem:[#allocation2] sm:$0x1] }
 0x164   : > { %v510_v14 = vmul.f32 0.00390625, %v509_v13 }
 0x166   : > { %776 = vmatmul.msk.f32.vlgmr.msra.gmra.mxu0 %vm516_vm4, %v510_v14 }
 0x1e3   : > { %v537_v19 = vpop.f32.mrf.mxu0 }
 0x1e4   : > { %v538_v20 = vadd.f32 %v537_v19, %v515_v18 }
 0x1e6   : > { %v540_v21 = vmax.f32 %v538_v20, 0.0 }
 0x1e8   : > { %777 = vmatmul.msk.f32.vlgmr.msra.gmra.mxu1 %vm516_vm4, %v540_v21 }
 0x265   : > { %v566_v27 = vpop.f32.mrf.mxu1 }
 0x266   : > { %v567_v28 = vadd.f32 %v566_v27, %v545_v26 }
 0x268   : > { %v778_v29 = vmul.f32 -1.442695, %v567_v28 }
 0x26a   : > { %870 = vpow2.f32 %v778_v29 }
 0x270   : > { %v871_v30 = vpop.eup %870 }
 0x271   : > { %v572_v31 = vadd.f32 1.0, %v871_v30 }
 0x273   : > { %872 = vrcp.f32 %v572_v31  ;;  %v584_v35 = vand.u32 2147483648, %v572_v31  ;;  %v582_v37 = vand.u32 2147483647, %v572_v31  ;;  %vm578_vm6 = vweird.f32 %v572_v31 }
 0x275   : > { %v585_v39 = vor.u32 1.1754944e-38, %v584_v35  ;;  %vm583_vm8 = vcmp.eq.f32.partialorder %v582_v37, 8.507059e+37 }
 0x279   : > { %v873_v32 = vpop.eup %872 }
 0x27a   : > { %v574_v33 = vmul.f32 %v873_v32, %v572_v31  ;;  %vm579_vm5 = vweird.f32 %v873_v32 }
 0x27b   : > { %vm580_vm7 = vmor %vm578_vm6, %vm579_vm5 }
 0x27c   : > { %v575_v34 = vsub.f32 1.0, %v574_v33 }
 0x27e   : > { %v576_v36 = vmul.f32 %v873_v32, %v575_v34 }
 0x280   : > { %v577_v38 = vadd.f32 %v873_v32, %v576_v36 }
 0x282   : > { %v581_v40 = vsel %vm580_vm7, %v873_v32, %v577_v38 }
 0x283   : > { %v586_v41 = vsel %vm583_vm8, %v585_v39, %v581_v40 }
 0x284   : > { %v589_v42 = vmul.f32 %v586_v41, %v510_v14  ;;  %588 = vst.msk [vmem:[%s361_s13] sm:$0x1] %vm373_vm0, %v586_v41 }
 0x286   : > { %779 = vmatmul.msk.f32.vlgmr.msra.gmra.mxu2 %vm516_vm4, %v589_v42 }
 0x287   : > { %961 = shalt.err (!%p958_p0)
}
 0x288   : > { %789 = dma.vmem_to_hbm [thread:$0]  (%p1185_p5), %s636_s11, 16, %s638_s18, %s621_s19   ;;  %vm618_vm9 = vcmask 73728  }
 0x289   : > { %s646_s10 = scalar_lea.hbm %s1319_s8, %s1044_s30  ;;  %s1339_s20 = sld [smem:[#allocation20_spill]] }
 0x28a   : > { %s367_s25 = scalar_lea.vmem [#allocation9], %s1205_s26  ;;  %s650_s23 = sshll.u32 %s646_s10, 4  ;;  %s651_s23 = int_to_ptr.hbm [resolvable:$true] %s650_s23 }
 0x28b   : > { %s648_s22 = sshll.u32 %s367_s25, 4  ;;  %s625_s24 = scalar_lea.sflag [#allocation10], %s1205_s26  ;;  %s649_s22 = int_to_ptr.vmem [resolvable:$true] %s648_s22 }
 0x28c   : > { %s976_s11 = sshra.s32 %s651_s23, 4  ;;  %s982_s14 = scalar_lea.hbm %s1319_s8, 2  ;;  %s977_s11 = int_to_ptr.hbm [resolvable:$true] %s976_s11 }
 0x28d   : > { %s978_s18 = scalar_lea.hbm %s977_s11, 1  ;;  %p983_p2 = scmp.lt.s32.totalorder %s977_s11, %s1319_s8 }
 0x28e   : > { %p979_p3 = scmp.ne.s32.totalorder %s977_s11, %s978_s18  ;;  %p984_p1 = scmp.lt.s32.totalorder %s982_s14, %s978_s18 }
 0x28f   : > { %v594_v43 = vld [vmem:[%s1339_s20] sm:$0x1] }
 0x290   : > { %p980_p7 = pnand %p979_p3, %p1185_p5  ;;  %p985_p4 = por %p984_p1, %p983_p2 }
 0x292   : > { %p981_p9 = pneg %p980_p7 }
 0x294   : > { %p986_p8 = pnand %p985_p4, %p981_p9 }
 0x309   : > { %v615_v44 = vpop.f32.mrf.mxu2 }
 0x30a   : > { %v616_v45 = vadd.f32 %v615_v44, %v594_v43 }
 0x30c   : > { %619 = vst.msk [vmem:[%s367_s25] sm:$0x1] %vm618_vm9, %v616_v45 }
 0x30d   : > { %989 = shalt.err (!%p986_p8)
}
 0x30e   : > { %790 = dma.vmem_to_hbm [thread:$0]  (%p1185_p5), %s649_s22, 16, %s651_s23, %s625_s24  }
 0x30f PF: > { %s1340_s26 = sld [smem:[#allocation15_spill]]  ;;  %p802_p10 = pnand %p769_p11, %p1155_p6 }
 0x310   : > { %s1342_s6 = sld [smem:[#allocation16_spill]] }
 0x311   : > { %p803_p12 = pneg %p802_p10 }
 0x315   : > { %s662_s27 = sand.u32 1, %s1340_s26  }
 0x316   : > { %s663_s10 = scalar_lea.sflag [#allocation5], %s662_s27 }
 0x317   : > { %1023 = dma.done.wait (%p803_p12), %s663_s10, 16  }
 0x318   : > { %1025 = vsyncadd (%p803_p12), %s663_s10, 4294967280  ;;  %s672_s13 = scalar_lea.sflag [#allocation10], %s662_s27 }
 0x319   : > { %1027 = dma.done.wait (%p803_p12), %s672_s13, 16  }
 0x31a   : > { %1029 = vsyncadd (%p803_p12), %s672_s13, 4294967280  ;;  %s29_s10 = sadd.s32 1, %s1342_s6   ;;  %s1343_s12 = sld [smem:[#allocation18_spill]] }
 0x31b   : > { %p26_p13 = scmp.ge.s32.totalorder %s29_s10, 4   ;;  %s1344_s27 = smov %s1036_s28 }
 0x31c   : > { %s1345_s28 = smov %s1040_s29  ;;  %s1346_s29 = smov %s1194_s21 }
 0x31d   : > { %s1347_s30 = smov %s1048_s9  ;;  %28 = sbr.rel (!%p26_p13) target bundleno = 12 (0xc), region = 129 }
 0x320   : > { %s1348_s9 = smov %s1343_s12 }
 0x322   :  { %677 = vsyncpa [#allocation4], 1 }
 0x323   :  { %679 = vsyncpa [#allocation4 + $0x1], 1 }
 0x324   :  { %680 = vsyncpa [#allocation7], 1 }
 0x325   :  { %681 = vsyncpa [#allocation5], 1 }
 0x326   :  { %683 = vsyncpa [#allocation5 + $0x1], 1 }
 0x327   :  { %684 = vsyncpa [#allocation10], 1 }
 0x328   :  { %686 = vsyncpa [#allocation10 + $0x1], 1 }

</bundles_post_ra>
